<compile_context>
chip_gen: v7x
topology: tpu7x:2x2x1
jax: 0.10.0
libtpu: 0.0.40
codegen_flags: <defaults>
</compile_context>

<pallas_src>
import math
import numpy as np
import jax
import jax.numpy as jnp
from jax import lax
from jax.experimental import pallas as pl
from jax.experimental.pallas import tpu as pltpu

# ----------------------- basis configuration (matgl defaults) -----------------------
MAX_N = 3
MAX_L = 3
CUTOFF = 5.0
FEAT = MAX_N * MAX_L            # 9 basis functions
TILE_T_BASIS = 8192             # kernel-1 triples per grid step
TILE_T_SCATTER_MAX = 2048       # kernel-2 triples per grid step (also bounded by E)
VMEM_LIMIT = 32 * 1024 * 1024


def _round_up(n, m):
    return int(pl.cdiv(int(n), int(m))) * int(m)


# --------- host-side deterministic setup: Bessel roots, norms, SH coefficients ---------
def _sph_jn_np(l, x):
    """Spherical Bessel j_l(x), x > 0, upward recursion in float64."""
    x = np.asarray(x, dtype=np.float64)
    j0 = np.sin(x) / x
    if l == 0:
        return j0
    j1 = np.sin(x) / (x * x) - np.cos(x) / x
    jm1, jc = j0, j1
    for ll in range(1, l):
        jm1, jc = jc, (2 * ll + 1) / x * jc - jm1
    return jc


def _bessel_roots(max_l, max_n):
    """roots[l, n] = (n+1)-th positive root of j_l (interlacing + bisection)."""
    n_extra = max_n + max_l
    roots = np.zeros((max_l, n_extra), dtype=np.float64)
    roots[0, :] = np.arange(1, n_extra + 1) * np.pi
    for l in range(1, max_l):
        for n in range(n_extra - l):
            lo, hi = roots[l - 1, n], roots[l - 1, n + 1]
            flo = _sph_jn_np(l, lo)
            for _ in range(80):
                mid = 0.5 * (lo + hi)
                fmid = _sph_jn_np(l, mid)
                if flo * fmid <= 0.0:
                    hi = mid
                else:
                    lo, flo = mid, fmid
            roots[l, n] = 0.5 * (lo + hi)
    return roots[:, :max_n]


_ROOTS = _bessel_roots(MAX_L, MAX_N)                                    # [MAX_L, MAX_N]
_SBF_NORM = (math.sqrt(2.0 / CUTOFF ** 3)
             / np.abs(np.stack([_sph_jn_np(l + 1, _ROOTS[l]) for l in range(MAX_L)])))
_SH_COEF = np.array([math.sqrt((2 * l + 1) / (4.0 * math.pi)) for l in range(MAX_L)])

# Folded per-row constant table [FEAT, 1 + MAX_L] (rows are l-major):
#   col 0     : root_{l,n} / cutoff
#   col 1 + l : one_hot(l) * norm_{l,n} * sqrt((2l+1)/4pi)
_CONSTS = np.zeros((FEAT, 1 + MAX_L), dtype=np.float64)
_CONSTS[:, 0] = (_ROOTS / CUTOFF).reshape(FEAT)
for _l in range(MAX_L):
    _CONSTS[_l * MAX_N:(_l + 1) * MAX_N, 1 + _l] = _SBF_NORM[_l] * _SH_COEF[_l]


def _sigmoid(x):
    # exp on the EUP + approximate EUP reciprocal (precision is not accuracy-critical).
    return pl.reciprocal(1.0 + jnp.exp(-x), approx=True)


# =========================== kernel 1: three-body basis ===========================
def _sbf_shf_kernel(rc_ref, const_ref, n_ref, out_ref):
    # rc_ref: [2, T] (row 0 = bond length r, row 1 = cos_theta)   lane-dense in T
    # const_ref: [FEAT, 1 + MAX_L] folded constants; n_ref: (1,) valid count in SMEM
    tile = rc_ref.shape[1]
    rc = rc_ref[...]
    r = jnp.minimum(rc[0:1, :], CUTOFF)        # torch ref: r[r > cutoff] = cutoff
    ct = rc[1:2, :]
    consts = const_ref[...]
    sr = consts[:, 0:1]                        # [FEAT, 1] scaled roots
    c0 = consts[:, 1:2]
    c1 = consts[:, 2:3]
    c2 = consts[:, 3:4]

    x = sr * r                                 # [FEAT, T]
    inv_x = 1.0 / x                            # single exact reciprocal, reused
    sin_x = jnp.sin(x)
    cos_x = jnp.cos(x)
    j0 = sin_x * inv_x                         # j_0
    j1 = (j0 - cos_x) * inv_x                  # j_1
    j2 = (3.0 * inv_x) * j1 - j0               # j_2 via upward recursion

    p1 = ct                                    # Legendre P_1
    p2 = 1.5 * ct * ct - 0.5                   # Legendre P_2  (P_0 folded into c0)
    val = c0 * j0 + c1 * (j1 * p1) + c2 * (j2 * p2)

    # zero the padded triple columns so consumers need no padding invariants
    col = pl.program_id(0) * tile + lax.broadcasted_iota(jnp.int32, (1, tile), 1)
    out_ref[...] = jnp.where(col < n_ref[0], val, 0.0)


def spherical_bessel_with_harmonics(triple_bond_lengths, cos_theta, tile_t=TILE_T_BASIS):
    """three_basis in lane-dense [FEAT, T_pad] layout + the valid triple count T.

    Padded columns (>= T) are exact zeros.  `basis[:, :T].T` recovers the torch
    [T, FEAT] layout (only needed standalone / for testing); the fused
    three_body_interactions pipeline consumes the padded lane-dense form directly.
    """
    n = int(triple_bond_lengths.shape[0])
    # keep >= 2 grid steps whenever possible so both v7x TensorCores are fed
    tile = min(tile_t, max(128, _round_up(pl.cdiv(n, 2), 128)))
    npad = _round_up(n, tile)
    rc = jnp.stack([triple_bond_lengths.astype(jnp.float32),
                    cos_theta.astype(jnp.float32)], axis=0)              # [2, n] packed
    rc = jnp.pad(rc, ((0, 0), (0, npad - n)), constant_values=1.0)       # pad away from x=0
    consts = jnp.asarray(_CONSTS, dtype=jnp.float32)
    nvalid = jnp.asarray([n], dtype=jnp.int32)

    basis_ft = pl.pallas_call(
        _sbf_shf_kernel,
        out_shape=jax.ShapeDtypeStruct((FEAT, npad), jnp.float32),
        grid=(npad // tile,),
        in_specs=[pl.BlockSpec((2, tile), lambda i: (0, i)),
                  pl.BlockSpec((FEAT, 1 + MAX_L), lambda i: (0, 0)),
                  pl.BlockSpec(memory_space=pltpu.MemorySpace.SMEM)],
        out_specs=pl.BlockSpec((FEAT, tile), lambda i: (0, i)),
        compiler_params=pltpu.CompilerParams(
            dimension_semantics=("parallel",),
            vmem_limit_bytes=VMEM_LIMIT),
    )(rc, consts, nvalid)
    return basis_ft, n


# ===================== kernel 2a: update_network_atom (Linear + sigmoid) =====================
def _atoms_kernel(node_ref, wa_ref, ba_ref, out_ref):
    z = jnp.dot(wa_ref[...], node_ref[...], preferred_element_type=jnp.float32,
                precision=lax.Precision.HIGHEST) + ba_ref[...]
    out_ref[...] = _sigmoid(z)


def _update_network_atom(node_feat, wa, ba, tile_v=2048):
    """atoms = sigmoid(node_feat @ Wa + ba), returned lane-dense as [FEAT, V_pad]."""
    V, U = node_feat.shape
    tile = min(tile_v, max(128, _round_up(V, 128)))
    vpad = _round_up(V, tile)
    node_t = jnp.pad(node_feat.astype(jnp.float32).T, ((0, 0), (0, vpad - V)))   # [U, Vp]
    wa_t = wa.astype(jnp.float32).T                                              # [FEAT, U]
    ba_t = ba.astype(jnp.float32).reshape(FEAT, 1)                               # [FEAT, 1]
    return pl.pallas_call(
        _atoms_kernel,
        out_shape=jax.ShapeDtypeStruct((FEAT, vpad), jnp.float32),
        grid=(vpad // tile,),
        in_specs=[pl.BlockSpec((U, tile), lambda i: (0, i)),
                  pl.BlockSpec((FEAT, U), lambda i: (0, 0)),
                  pl.BlockSpec((FEAT, 1), lambda i: (0, 0))],
        out_specs=pl.BlockSpec((FEAT, tile), lambda i: (0, i)),
        compiler_params=pltpu.CompilerParams(
            dimension_semantics=("parallel",),
            vmem_limit_bytes=VMEM_LIMIT),
    )(node_t, wa_t, ba_t)


# ============== kernel 2b: weighted basis -> segment scatter -> gated-MLP bond update ==============
def _three_body_kernel(basis_ref, gath_ref, seg_ref, edge_ref, w12_ref, out_ref, acc_ref):
    n_edges = acc_ref.shape[0]
    tt = basis_ref.shape[1]
    step = pl.program_id(0)

    @pl.when(step == 0)
    def _init():
        acc_ref[...] = jnp.zeros_like(acc_ref)

    # basis * atoms[end_atom_index]   (both lane-dense [FEAT, TT])
    weighted = basis_ref[...] * gath_ref[...]

    # scatter_sum over (sorted) segment ids: per-tile one-hot contraction on the MXU.
    # Padded triples carry zero basis AND seg id == E, so they contribute nothing.
    # TODO(synk): for very large E, use a contiguous segmented reduction driven by
    # scalar-prefetched per-edge triple offsets instead of the (E, TT) one-hot.
    onehot = (lax.broadcasted_iota(jnp.int32, (n_edges, tt), 0)
              == seg_ref[...]).astype(jnp.float32)                        # [E, TT]
    acc_ref[...] += lax.dot_general(
        onehot, weighted, (((1,), (1,)), ((), ())),
        preferred_element_type=jnp.float32,
        precision=lax.Precision.HIGHEST)                                  # [E, FEAT]

    # finalize: update_network_bond (fused W1|W2 gated MLP, no bias) + residual add
    @pl.when(step == pl.num_programs(0) - 1)
    def _fin():
        u = out_ref.shape[1]
        g = jnp.dot(acc_ref[...], w12_ref[...], preferred_element_type=jnp.float32,
                    precision=lax.Precision.HIGHEST)                      # [E, 2U]
        g1 = g[:, :u]
        g2 = g[:, u:]
        out_ref[...] = edge_ref[...] + (g1 * _sigmoid(g1)) * _sigmoid(g2)


def three_body_interactions(graph_dst, lg_src, lg_dst, n_triple_ij, basis_ft, n_triples,
                            three_cutoff, node_feat, edge_feat, params):
    """Pallas equivalent of ThreeBodyInteractions.forward (returns updated edge_feat).

    `basis_ft` is the lane-dense [FEAT, T_pad] output of spherical_bessel_with_harmonics
    (padded columns are zero) and `n_triples` is the valid triple count.
    The torch reference's per-triple cutoff `weights` are computed then discarded
    (scatter_sum uses `basis`), so lg_src / three_cutoff do not affect the output.
    """
    del lg_src, three_cutoff
    E, U = edge_feat.shape
    T = int(n_triples)
    TP = basis_ft.shape[1]

    # index plumbing (mirrors torch.gather + get_segment_indices_from_n)
    end_idx = jnp.take(graph_dst.astype(jnp.int32), lg_dst.astype(jnp.int32))        # [T]
    seg_ids = jnp.repeat(jnp.arange(E, dtype=jnp.int32),
                         n_triple_ij.astype(jnp.int32), total_repeat_length=T)       # [T] sorted

    # update_network_atom (Pallas) -> [FEAT, V_pad] lane-dense
    atoms_ft = _update_network_atom(node_feat, params["wa"], params["ba"])

    # kernel-2 triple tile, bounded so the per-tile (E, TT) one-hot stays <= ~8 MiB
    tt = max(128, min(TILE_T_SCATTER_MAX, ((1 << 20) // max(E, 1)) // 128 * 128, TP))
    tp2 = _round_up(TP, tt)

    basis_p = jnp.pad(basis_ft, ((0, 0), (0, tp2 - TP)))                              # zeros
    end_p = jnp.pad(end_idx, (0, tp2 - T))                                            # idx 0
    seg_p = jnp.pad(seg_ids, (0, tp2 - T), constant_values=E).reshape(1, tp2)         # E = none

    # per-triple gather atoms[:, end_atom_index] (XLA gather between the Pallas calls)
    gathered_ft = jnp.take(atoms_ft, end_p, axis=1)                                   # [FEAT, tp2]

    # fused gated-MLP weights
    w12 = jnp.concatenate([params["w1"].astype(jnp.float32),
                           params["w2"].astype(jnp.float32)], axis=1)                 # [FEAT, 2U]

    return pl.pallas_call(
        _three_body_kernel,
        out_shape=jax.ShapeDtypeStruct((E, U), jnp.float32),
        grid=(tp2 // tt,),
        in_specs=[pl.BlockSpec((FEAT, tt), lambda i: (0, i)),     # basis tile
                  pl.BlockSpec((FEAT, tt), lambda i: (0, i)),     # gathered atoms tile
                  pl.BlockSpec((1, tt), lambda i: (0, i)),        # segment ids tile
                  pl.BlockSpec((E, U), lambda i: (0, 0)),         # edge_feat (resident)
                  pl.BlockSpec((FEAT, 2 * U), lambda i: (0, 0))], # W1|W2 (resident)
        out_specs=pl.BlockSpec((E, U), lambda i: (0, 0)),
        scratch_shapes=[pltpu.VMEM((E, FEAT), jnp.float32)],      # new_bonds accumulator
        compiler_params=pltpu.CompilerParams(
            dimension_semantics=("arbitrary",),
            vmem_limit_bytes=VMEM_LIMIT),
    )(basis_p, gathered_ft, seg_p, edge_feat.astype(jnp.float32), w12)


# ------------------------------ numpy references ------------------------------
def _legendre_np(l, x):
    p0 = np.ones_like(x)
    if l == 0:
        return p0
    p1 = x
    for ll in range(2, l + 1):
        p0, p1 = p1, ((2 * ll - 1) * x * p1 - (ll - 1) * p0) / ll
    return p1


def _sbf_reference_np(r, ct):
    r = r.astype(np.float64)
    ct = ct.astype(np.float64)
    rc = np.minimum(r, CUTOFF)
    out = np.zeros((r.shape[0], FEAT), dtype=np.float64)
    for l in range(MAX_L):
        x = rc[:, None] * _ROOTS[l][None, :] / CUTOFF
        jl = _sph_jn_np(l, x)
        yl = _SH_COEF[l] * _legendre_np(l, ct)
        out[:, l * MAX_N:(l + 1) * MAX_N] = jl * _SBF_NORM[l][None, :] * yl[:, None]
    return out


def _three_body_reference_np(node_feat, wa, ba, three_basis, end_idx, seg_ids,
                             n_edges, w1, w2, edge_feat):
    sig = lambda v: 1.0 / (1.0 + np.exp(-v))
    atoms = sig(node_feat @ wa + ba)
    basis = three_basis * atoms[end_idx]
    new_bonds = np.zeros((n_edges, basis.shape[1]), dtype=np.float64)
    np.add.at(new_bonds, seg_ids, basis)
    g1 = new_bonds @ w1
    g2 = new_bonds @ w2
    return edge_feat + (g1 * sig(g1)) * sig(g2)


# ------------------------------------ demo ------------------------------------
if __name__ == "__main__":
    key = jax.random.PRNGKey(0)
    (k_r, k_ct, k_gdst, k_ldst, k_tc, k_node, k_edge,
     k_wa, k_ba, k_w1, k_w2) = jax.random.split(key, 11)

    V, E, U = 16, 64, 32                                     # atoms, bonds, feature width
    n_triple_ij = (jnp.arange(E, dtype=jnp.int32) % 8) + 1   # triples per bond
    T = int(jnp.sum(n_triple_ij))                            # 288 bond-angle triples

    graph_dst = jax.random.randint(k_gdst, (E,), 0, V, dtype=jnp.int32)
    lg_dst = jax.random.randint(k_ldst, (T,), 0, E, dtype=jnp.int32)
    lg_src = jnp.repeat(jnp.arange(E, dtype=jnp.int32), n_triple_ij,
                        total_repeat_length=T)

    r = jax.random.uniform(k_r, (T,), minval=0.5, maxval=4.5, dtype=jnp.float32)
    cos_theta = jax.random.uniform(k_ct, (T,), minval=-1.0, maxval=1.0,
                                   dtype=jnp.float32)
    three_cutoff = jax.random.uniform(k_tc, (E,), dtype=jnp.float32)

    node_feat = jax.random.normal(k_node, (V, U), dtype=jnp.float32)
    edge_feat = jax.random.normal(k_edge, (E, U), dtype=jnp.float32)
    params = dict(
        wa=0.1 * jax.random.normal(k_wa, (U, FEAT), dtype=jnp.float32),
        ba=0.1 * jax.random.normal(k_ba, (1, FEAT), dtype=jnp.float32),
        w1=0.1 * jax.random.normal(k_w1, (FEAT, U), dtype=jnp.float32),
        w2=0.1 * jax.random.normal(k_w2, (FEAT, U), dtype=jnp.float32),
    )

    # --- kernel 1: three-body basis expansion (lane-dense [9, T_pad], zero-padded) ---
    basis_ft, ntrip = spherical_bessel_with_harmonics(r, cos_theta)
    basis_ft = jax.block_until_ready(basis_ft)
    basis_np = np.asarray(basis_ft)
    np.testing.assert_allclose(basis_np[:, :T].T,
                               _sbf_reference_np(np.asarray(r), np.asarray(cos_theta)),
                               rtol=3e-4, atol=1e-5)
    np.testing.assert_array_equal(basis_np[:, T:], 0.0)     # padded columns are exact zeros

    # --- kernel 2: ThreeBodyInteractions.forward (tiled, fused) ---
    edge_out = three_body_interactions(graph_dst, lg_src, lg_dst, n_triple_ij,
                                       basis_ft, ntrip, three_cutoff, node_feat,
                                       edge_feat, params)
    edge_out = jax.block_until_ready(edge_out)

    end_idx_np = np.asarray(graph_dst)[np.asarray(lg_dst)]
    seg_ids_np = np.repeat(np.arange(E), np.asarray(n_triple_ij))
    ref = _three_body_reference_np(
        np.asarray(node_feat, dtype=np.float64), np.asarray(params["wa"], np.float64),
        np.asarray(params["ba"], np.float64), basis_np[:, :T].T.astype(np.float64),
        end_idx_np, seg_ids_np, E, np.asarray(params["w1"], np.float64),
        np.asarray(params["w2"], np.float64), np.asarray(edge_feat, np.float64))
    np.testing.assert_allclose(np.asarray(edge_out), ref, rtol=2e-3, atol=1e-3)

    print("KERNEL_OK")
</pallas_src>

<mosaic_0001>
module attributes {stable_mosaic.version = 11 : i64} {
  func.func @_sbf_shf_kernel(%arg0: i32, %arg1: memref<2x256xf32, #tpu.memory_space<vmem>>, %arg2: memref<9x4xf32, #tpu.memory_space<vmem>>, %arg3: memref<1xi32, #tpu.memory_space<smem>>, %arg4: memref<9x256xf32, #tpu.memory_space<vmem>>) attributes {dimension_semantics = [#tpu.dimension_semantics<parallel>], iteration_bounds = array<i64: 2>, scalar_prefetch = 0 : i64, scratch_operands = 0 : i64, tpu.core_type = #tpu.core_type<tc>, window_params = [{transform_indices = @transform_0, window_bounds = array<i64: 2, 256>}, {pipeline_mode = #tpu.pipeline_mode<synchronous>, transform_indices = @transform_1, window_bounds = array<i64: 9, 4>}, {transform_indices = @transform_2, window_bounds = array<i64: 1>}, {transform_indices = @transform_3, window_bounds = array<i64: 9, 256>}]} {
    %c0 = arith.constant 0 : index
    %c0_0 = arith.constant 0 : index
    %0 = vector.load %arg1[%c0, %c0_0] : memref<2x256xf32, #tpu.memory_space<vmem>>, vector<2x256xf32>
    %1 = vector.extract_strided_slice %0 {offsets = [0, 0], sizes = [1, 256], strides = [1, 1]} : vector<2x256xf32> to vector<1x256xf32>
    %cst = arith.constant 5.000000e+00 : f32
    %2 = vector.broadcast %cst : f32 to vector<1x256xf32>
    %3 = arith.minimumf %1, %2 : vector<1x256xf32>
    %4 = vector.extract_strided_slice %0 {offsets = [1, 0], sizes = [1, 256], strides = [1, 1]} : vector<2x256xf32> to vector<1x256xf32>
    %c0_1 = arith.constant 0 : index
    %c0_2 = arith.constant 0 : index
    %5 = vector.load %arg2[%c0_1, %c0_2] : memref<9x4xf32, #tpu.memory_space<vmem>>, vector<9x4xf32>
    %6 = vector.extract_strided_slice %5 {offsets = [0, 0], sizes = [9, 1], strides = [1, 1]} : vector<9x4xf32> to vector<9x1xf32>
    %7 = vector.extract_strided_slice %5 {offsets = [0, 1], sizes = [9, 1], strides = [1, 1]} : vector<9x4xf32> to vector<9x1xf32>
    %8 = vector.extract_strided_slice %5 {offsets = [0, 2], sizes = [9, 1], strides = [1, 1]} : vector<9x4xf32> to vector<9x1xf32>
    %9 = vector.extract_strided_slice %5 {offsets = [0, 3], sizes = [9, 1], strides = [1, 1]} : vector<9x4xf32> to vector<9x1xf32>
    %10 = vector.broadcast %6 : vector<9x1xf32> to vector<9x256xf32>
    %11 = vector.broadcast %3 : vector<1x256xf32> to vector<9x256xf32>
    %12 = arith.mulf %10, %11 : vector<9x256xf32>
    %cst_3 = arith.constant 1.000000e+00 : f32
    %13 = vector.broadcast %cst_3 : f32 to vector<9x256xf32>
    %14 = arith.divf %13, %12 : vector<9x256xf32>
    %15 = math.sin %12 : vector<9x256xf32>
    %16 = math.cos %12 : vector<9x256xf32>
    %17 = arith.mulf %15, %14 : vector<9x256xf32>
    %18 = arith.subf %17, %16 : vector<9x256xf32>
    %19 = arith.mulf %18, %14 : vector<9x256xf32>
    %cst_4 = arith.constant 3.000000e+00 : f32
    %20 = vector.broadcast %cst_4 : f32 to vector<9x256xf32>
    %21 = arith.mulf %20, %14 : vector<9x256xf32>
    %22 = arith.mulf %21, %19 : vector<9x256xf32>
    %23 = arith.subf %22, %17 : vector<9x256xf32>
    %cst_5 = arith.constant 1.500000e+00 : f32
    %24 = vector.broadcast %cst_5 : f32 to vector<1x256xf32>
    %25 = arith.mulf %24, %4 : vector<1x256xf32>
    %26 = arith.mulf %25, %4 : vector<1x256xf32>
    %cst_6 = arith.constant 5.000000e-01 : f32
    %27 = vector.broadcast %cst_6 : f32 to vector<1x256xf32>
    %28 = arith.subf %26, %27 : vector<1x256xf32>
    %29 = vector.broadcast %7 : vector<9x1xf32> to vector<9x256xf32>
    %30 = arith.mulf %29, %17 : vector<9x256xf32>
    %31 = vector.broadcast %4 : vector<1x256xf32> to vector<9x256xf32>
    %32 = arith.mulf %19, %31 : vector<9x256xf32>
    %33 = vector.broadcast %8 : vector<9x1xf32> to vector<9x256xf32>
    %34 = arith.mulf %33, %32 : vector<9x256xf32>
    %35 = arith.addf %30, %34 : vector<9x256xf32>
    %36 = vector.broadcast %28 : vector<1x256xf32> to vector<9x256xf32>
    %37 = arith.mulf %23, %36 : vector<9x256xf32>
    %38 = vector.broadcast %9 : vector<9x1xf32> to vector<9x256xf32>
    %39 = arith.mulf %38, %37 : vector<9x256xf32>
    %40 = arith.addf %35, %39 : vector<9x256xf32>
    %c256_i32 = arith.constant 256 : i32
    %41 = arith.muli %arg0, %c256_i32 : i32
    %42 = tpu.iota {dimensions = array<i32: 1>} : vector<1x256xi32>
    %43 = vector.broadcast %41 : i32 to vector<1x256xi32>
    %44 = arith.addi %43, %42 : vector<1x256xi32>
    %c0_7 = arith.constant 0 : index
    %45 = memref.load %arg3[%c0_7] : memref<1xi32, #tpu.memory_space<smem>>
    %46 = vector.broadcast %45 : i32 to vector<1x256xi32>
    %47 = arith.cmpi slt, %44, %46 : vector<1x256xi32>
    %cst_8 = arith.constant 0.000000e+00 : f32
    %48 = vector.shape_cast %47 : vector<1x256xi1> to vector<1x256xi1>
    %49 = vector.broadcast %48 : vector<1x256xi1> to vector<9x256xi1>
    %50 = vector.broadcast %cst_8 : f32 to vector<9x256xf32>
    %51 = arith.select %49, %40, %50 : vector<9x256xi1>, vector<9x256xf32>
    %c0_9 = arith.constant 0 : index
    %c0_10 = arith.constant 0 : index
    %52 = vector.load %arg4[%c0_9, %c0_10] : memref<9x256xf32, #tpu.memory_space<vmem>>, vector<9x256xf32>
    tpu.vector_store %arg4[%c0_9, %c0_10], %51 {strides = array<i32>} : memref<9x256xf32, #tpu.memory_space<vmem>>, vector<9x256xf32>,
    return
  }
  func.func @transform_0(%arg0: i32) -> (i32, i32) {
    %c0_i32 = arith.constant 0 : i32
    %c0_i32_0 = arith.constant 0 : i32
    return %c0_i32, %arg0 : i32, i32
  }
  func.func @transform_1(%arg0: i32) -> (i32, i32) {
    %c0_i32 = arith.constant 0 : i32
    %c0_i32_0 = arith.constant 0 : i32
    %c0_i32_1 = arith.constant 0 : i32
    return %c0_i32, %c0_i32_0 : i32, i32
  }
  func.func @transform_2(%arg0: i32) -> i32 {
    %c0_i32 = arith.constant 0 : i32
    %c0_i32_0 = arith.constant 0 : i32
    return %c0_i32 : i32
  }
  func.func @transform_3(%arg0: i32) -> (i32, i32) {
    %c0_i32 = arith.constant 0 : i32
    %c0_i32_0 = arith.constant 0 : i32
    return %c0_i32, %arg0 : i32, i32
  }
}

</mosaic_0001>

<bundles_post_ra>
// kernel: tpu_custom_call.1
= control target key start
LH: loop header
LB: loop body
LE: loop exit
PB: predicated region body
PF: predicated region fallthrough
CT: control target
= control target key end

     0   :  { %s2140_s0 = inlined_call_operand.vmem [shape: f32[2,512], index: 0, kind: input, shape index: {}]   ;;  %s2141_s1 = inlined_call_operand.vmem [shape: f32[9,4], index: 1, kind: input, shape index: {}]   ;;  %s2142_s2 = inlined_call_operand.<no memory space> [shape: s32[1], index: 2, kind: input, shape index: {}]   ;;  %s2143_s3 = inlined_call_operand.hbm [shape: f32[9,512], index: 3, kind: output, shape index: {}]  }
   0x1   :  { %8 = sst [smem:[#allocation2]] %s2142_s2 }
   0x2   :  { %9 = vsyncpa [#allocation4], 0 }
   0x3   :  { %11 = vsyncpa [#allocation4 + $0x1], 0  ;;  %s1508_s14 = smov 0   ;;  %s1510_s15 = smov 0  }
   0x4   :  { %s1512_s16 = smov 0   ;;  %s1514_s17 = smov 0  }
   0x5 LB: > { %s1529_s2 = sadd.s32 4294967295, %s1469_s17   ;;  %s1262_s18 = sadd.s32 4294967294, %s1469_s17   ;;  %s1469_s17 = sphi %s1514_s17, %s2161_s17   ;;  %s1465_s16 = sphi %s1512_s16, %s2160_s16   ;;  %s1461_s15 = sphi %s1510_s15, %s2159_s15   ;;  %s1457_s14 = sphi %s1508_s14, %s2158_s14  }
   0x6   : > { %s1533_s19 = sadd.s32 1, %s1469_s17   ;;  %s92_s20 = sadd.s32 1, %s1465_s16 }
   0x7   : > { %s89_s21 = ssub.s32 %s1469_s17, %s1533_s19  ;;  %p102_p0 = scmp.ne.s32.totalorder %s1465_s16, %s1461_s15 }
   0x8   : > { %p90_p1 = scmp.eq.s32.totalorder %s89_s21, 0  ;;  %p103_p2 = scmp.eq.s32.totalorder %s1529_s2, 1 }
   0x9   : > { %p108_p3 = scmp.ne.s32.totalorder %s1461_s15, %s1457_s14  ;;  %p109_p4 = scmp.eq.s32.totalorder %s1262_s18, 1 }
   0xa   : > { %s1544_s22 = scalar_select %p90_p1, %s1465_s16, %s92_s20  }
   0xb   : > { %p1546_p5 = por %p103_p2, %p102_p0  ;;  %p1550_p6 = por %p109_p4, %p108_p3 }
   0xc   : > { %p1265_p7 = scmp.ge.s32.totalorder %s1469_s17, 1  ;;  %p142_p8 = scmp.lt.s32.totalorder %s1469_s17, 3 }
   0xe   : > { %p143_p9 = pnand %p1265_p7, %p142_p8 }
   0xf   : > { %v175_v0 = vld [vmem:[%s2141_s1] sm:$0xff] (!%p143_p9)  ;;  %v1471_v1 = vmov (!%p143_p9), 0   ;;  %v1472_v2 = vmov (!%p143_p9), 1   ;;  %v176_v3 = vld [vmem:[%s2141_s1 + $0x8] sm:$0x1] (!%p143_p9)  ;;  %v1473_v4 = vmov (!%p143_p9), 2   ;;  %v188_v6 = vlaneseq (!%p143_p9) }
  0x10   : > { %146 = sbr.rel (%p143_p9) target bundleno = 315 (0x13b), region = 32  ;;  %1377 = vset.pattern.permute.xlu0 (!%p143_p9), %v1471_v1  ;;  %1378 = vset.pattern.permute.xlu1 (!%p143_p9), %v1472_v2  ;;  %v1474_v5 = vmov (!%p143_p9), 3   ;;  %s1267_s29 = sshll.u32 (!%p143_p9), %s1529_s2, 1  ;;  %v1475_v48 = vmov (!%p143_p9), 920167782  }
  0x11   : > { %179 = vperm.xlu0 (!%p143_p9), %1377, %v175_v0   ;;  %1074 = vperm.xlu1 (!%p143_p9), %1378, %v175_v0   ;;  %p167_p10 = scmp.lt.s32.totalorder (!%p143_p9), %s1267_s29, 3  ;;  %v1567_v7 = vshrl.u32 (!%p143_p9), %v188_v6, 7  ;;  %v1476_v50 = vmov (!%p143_p9), 1326507024   ;;  %v1477_v53 = vmov (!%p143_p9), 2102212464  }
  0x12   : > { %s1988_s7 = sld [smem:[#allocation2]] (!%p143_p9)  ;;  %s1302_s8 = sshll.u32 (!%p143_p9), %s1529_s2, 8 }
  0x13   : > { %v190_v9 = vsub.s32 (!%p143_p9), 0, %v1567_v7  ;;  %v194_v10 = vsub.s32 (!%p143_p9), 2, %v1567_v7  ;;  %s163_s9 = sand.u32 (!%p143_p9), 1, %s1461_s15   ;;  %s2090_s20 = scalar_lea.hbm (!%p143_p9), %s2143_s3, %s1302_s8 }
  0x14   : > { %s1266_s10 = sshll.u32 (!%p143_p9), %s163_s9, 5  ;;  %s2099_s21 = scalar_lea.sflag (!%p143_p9), [#allocation4], %s163_s9 }
  0x15   : > { %184 = vperm.xlu0 (!%p143_p9), %1377, %v176_v3   ;;  %1078 = vperm.xlu1 (!%p143_p9), %1378, %v176_v3   ;;  %s2071_s11 = scalar_lea.vmem (!%p143_p9), [#allocation3], %s1266_s10  ;;  %s1481_s2 = smov (!%p143_p9), [#allocation3]  }
  0x16   : > { %s1200_s12 = sshll.u32 (!%p143_p9), %s2071_s11, 4  ;;  %s1411_s26 = sshll.u32 (!%p143_p9), %s1481_s2, 4  ;;  %s2092_s12 = int_to_ptr.vmem [resolvable:$true] %s1200_s12  ;;  %s1412_s26 = int_to_ptr.vmem [resolvable:$false] %s1411_s26 }
  0x17   : > { %s2163_s29 = smov (!%p167_p10, %s1267_s29), 3  ;;  %s1407_s25 = scalar_lea.vmem %s2092_s12, 512 }
  0x18   : > { %s1268_s30 = sshll.u32 %s2163_s29, 1  ;;  %p1408_p11 = scmp.ne.s32.totalorder %s2092_s12, %s1407_s25 }
  0x19   : > { %1380 = vset.pattern.permute.xlu1 %v1473_v4  ;;  %1379 = vset.pattern.permute.xlu0 %v1473_v4  ;;  %s170_s6 = scalar_lea.vmem %s2140_s0, %s1268_s30  ;;  %s1413_s27 = scalar_lea.vmem %s1412_s26, 1024 }
  0x1a   : > { %1113 = vperm.xlu1 %1380, %v176_v3   ;;  %1109 = vperm.xlu0 %1379, %v175_v0   ;;  %v1569_v8 = vld [vmem:[%s170_s6] sm:$0xf]  ;;  %p1409_p12 = pnand %p1408_p11, %p1546_p5  ;;  %p1414_p0 = scmp.lt.s32.totalorder %s2092_s12, %s1412_s26 }
  0x1b   : > { %v174_v11 = vmin.f32 %v1569_v8, 5.0  ;;  %p1415_p1 = scmp.lt.s32.totalorder %s1413_s27, %s1407_s25 }
  0x1c   : > { %p1410_p13 = pneg %p1409_p12 }
  0x1d   : > { %v191_v12 = vrot.slane %v174_v11, %v190_v9  ;;  %v195_v13 = vrot.slane %v174_v11, %v194_v10  ;;  %p1416_p2 = por %p1415_p1, %p1414_p0 }
  0x1e   : > { %1381 = vset.pattern.permute.xlu1 %v1474_v5  ;;  %1382 = vset.pattern.permute.xlu0 %v1474_v5 }
  0x1f   : > { %1148 = vperm.xlu1 %1381, %v175_v0   ;;  %1152 = vperm.xlu0 %1382, %v176_v3   ;;  %v201_v14 = vrot.slane %v191_v12, %v190_v9  ;;  %v205_v15 = vrot.slane %v195_v13, %v190_v9  ;;  %p1417_p3 = pnand %p1416_p2, %p1410_p13 }
  0x90   : > { %v180_v16 = vpop.permute.xlu0 %179 }
  0x91   : > { %v1574_v17 = vmul.f32 %v201_v14, %v180_v16  ;;  %v1576_v18 = vmul.f32 %v205_v15, %v180_v16 }
  0x93   : > { %v221_v19 = vand.u32 2139095040, %v1574_v17  ;;  %v325_v20 = vand.u32 2139095040, %v1576_v18  ;;  %v218_v33 = vand.u32 2147483647, %v1574_v17  ;;  %v322_v35 = vand.u32 2147483647, %v1576_v18 }
  0x94   : > { %v185_v21 = vpop.permute.xlu0 %184 }
  0x95   : > { %v222_v22 = vshrl.u32 %v221_v19, 23  ;;  %v326_v23 = vshrl.u32 %v325_v20, 23  ;;  %v1580_v24 = vmul.f32 %v201_v14, %v185_v21  ;;  %v1582_v25 = vmul.f32 %v205_v15, %v185_v21 }
  0x96   : > { %v225_v42 = vand.u32 8388607, %v218_v33  ;;  %v329_v44 = vand.u32 8388607, %v322_v35  ;;  %v1478_v21 = vmov 683565275  }
  0x97   : > { %v1269_v26 = vadd.s32 4294967169, %v222_v22  ;;  %v1273_v27 = vadd.s32 4294967169, %v326_v23  ;;  %v429_v28 = vand.u32 2139095040, %v1580_v24  ;;  %v533_v29 = vand.u32 2139095040, %v1582_v25 }
  0x98   : > { %v226_v52 = vor.u32 8388608, %v225_v42  ;;  %v330_v57 = vor.u32 8388608, %v329_v44  ;;  %v426_v63 = vand.u32 2147483647, %v1580_v24  ;;  %v1479_v23 = vmov 2475754826  }
  0x99   : > { %v228_v30 = vadd.s32 1, %v1269_v26  ;;  %v332_v31 = vadd.s32 1, %v1273_v27  ;;  %v430_v32 = vshrl.u32 %v429_v28, 23  ;;  %v534_v34 = vshrl.u32 %v533_v29, 23 }
  0x9a   : > { %v1616_v5 = vshll.u32 %v226_v52, 8  ;;  %v1623_v12 = vshll.u32 %v330_v57, 8  ;;  %v1630_v14 = vand.u32 8388607, %v426_v63  ;;  %v1480_v28 = vmov 2131351028  }
  0x9b   : > { %vm229_vm0 = vcmp.gt.s32.totalorder %v228_v30, 0  ;;  %vm333_vm1 = vcmp.gt.s32.totalorder %v332_v31, 0  ;;  %v1277_v36 = vadd.s32 4294967169, %v430_v32  ;;  %v1281_v39 = vadd.s32 4294967169, %v534_v34 }
  0x9c   : > { %v230_v37 = vsel %vm229_vm0, %v228_v30, 0  ;;  %v334_v38 = vsel %vm333_vm1, %v332_v31, 0 }
  0x9d   : > { %v232_v40 = vand.u32 31, %v230_v37  ;;  %v1588_v41 = vand.u32 31, %v334_v38  ;;  %v436_v43 = vadd.s32 1, %v1277_v36  ;;  %v540_v46 = vadd.s32 1, %v1281_v39 }
  0x9e   : > { %v231_v61 = vshrl.u32 %v230_v37, 5  ;;  %v1607_v62 = vshrl.u32 %v334_v38, 5 }
  0x9f   : > { %v233_v45 = vsub.s32 32, %v232_v40  ;;  %v1595_v47 = vsub.s32 32, %v1588_v41  ;;  %vm437_vm2 = vcmp.gt.s32.totalorder %v436_v43, 0  ;;  %v244_v54 = vshll.u32 %v1477_v53, %v232_v40 }
  0xa0   : > { %v247_v55 = vshll.u32 %v1475_v48, %v232_v40  ;;  %v438_v56 = vsel %vm437_vm2, %v436_v43, 0  ;;  %vm541_vm3 = vcmp.gt.s32.totalorder %v540_v46, 0  ;;  %v348_v2 = vshll.u32 %v1477_v53, %v1588_v41 }
  0xa1   : > { %v245_v49 = vshrl.u32 %v1475_v48, %v233_v45  ;;  %v248_v51 = vshrl.u32 %v1476_v50, %v233_v45  ;;  %v349_v58 = vshrl.u32 %v1475_v48, %v1595_v47  ;;  %v352_v59 = vshrl.u32 %v1476_v50, %v1595_v47 }
  0xa2   : > { %v1605_v60 = vand.u32 31, %v438_v56  ;;  %v351_v3 = vshll.u32 %v1475_v48, %v1588_v41  ;;  %v1614_v4 = vsel %vm541_vm3, %v540_v46, 0  ;;  %vm253_vm4 = vcmp.lt.s32.totalorder %v231_v61, 4 }
  0xa3   : > { %v246_v0 = vor.u32 %v245_v49, %v244_v54  ;;  %v249_v1 = vor.u32 %v248_v51, %v247_v55  ;;  %v1618_v9 = vor.u32 %v349_v58, %v348_v2  ;;  %vm357_vm5 = vcmp.lt.s32.totalorder %v1607_v62, 4 }
  0xa4   : > { %v353_v10 = vor.u32 %v352_v59, %v351_v3  ;;  %v1621_v11 = vsub.s32 32, %v1605_v60  ;;  %v1626_v13 = vshrl.u32 %v438_v56, 5  ;;  %v452_v19 = vshll.u32 %v1477_v53, %v1605_v60 }
  0xa5   : > { %v259_v15 = vsel %vm253_vm4, %v246_v0, 920167782  ;;  %v263_v16 = vsel %vm253_vm4, %v249_v1, 1326507024  ;;  %v1637_v20 = vand.u32 31, %v1614_v4  ;;  %v235_v22 = vshll.u32 %v1478_v21, %v232_v40 }
  0xa6   : > { %v236_v26 = vshrl.u32 %v1479_v23, %v233_v45  ;;  %v238_v27 = vshll.u32 %v1479_v23, %v232_v40  ;;  %v239_v29 = vshrl.u32 %v1480_v28, %v233_v45  ;;  %v363_v30 = vsel %vm357_vm5, %v1618_v9, 920167782 }
  0xa7   : > { %v367_v31 = vsel %vm357_vm5, %v353_v10, 1326507024  ;;  %v453_v32 = vshrl.u32 %v1475_v48, %v1621_v11  ;;  %v1652_v34 = vshll.u32 %v1475_v48, %v1605_v60  ;;  %v241_v38 = vshll.u32 %v1480_v28, %v232_v40 }
  0xa8   : > { %v237_v36 = vor.u32 %v236_v26, %v235_v22  ;;  %v240_v37 = vor.u32 %v239_v29, %v238_v27  ;;  %v242_v39 = vshrl.u32 %v1477_v53, %v233_v45  ;;  %v1658_v42 = vshrl.u32 %v1476_v50, %v1621_v11 }
  0xa9   : > { %v234_v43 = vshrl.u32 %v1478_v21, %v233_v45  ;;  %vm250_vm6 = vcmp.lt.s32.totalorder %v231_v61, 1  ;;  %vm252_vm7 = vcmp.lt.s32.totalorder %v231_v61, 3  ;;  %vm251_vm8 = vcmp.lt.s32.totalorder %v231_v61, 2 }
  0xaa   : > { %v243_v44 = vor.u32 %v242_v39, %v241_v38  ;;  %v258_v46 = vsel %vm250_vm6, %v237_v36, %v240_v37  ;;  %v264_v49 = vsel %vm252_vm7, %v246_v0, %v263_v16  ;;  %v339_v52 = vshll.u32 %v1478_v21, %v1588_v41 }
  0xab   : > { %v254_v51 = vsel %vm250_vm6, %v234_v43, %v237_v36  ;;  %v340_v40 = vshrl.u32 %v1479_v23, %v1595_v47  ;;  %v342_v54 = vshll.u32 %v1479_v23, %v1588_v41  ;;  %v343_v57 = vshrl.u32 %v1480_v28, %v1595_v47 }
  0xac   : > { %v255_v55 = vsel %vm253_vm4, %v243_v44, 2102212464  ;;  %v260_v56 = vsel %vm252_vm7, %v243_v44, %v259_v15  ;;  %v262_v45 = vsel %vm250_vm6, %v240_v37, %v243_v44  ;;  %vm461_vm9 = vcmp.lt.s32.totalorder %v1626_v13, 4 }
  0xad   : > { %v256_v58 = vsel %vm252_vm7, %v240_v37, %v255_v55  ;;  %v261_v59 = vsel %vm251_vm8, %v258_v46, %v260_v56  ;;  %v265_v0 = vsel %vm251_vm8, %v262_v45, %v264_v49  ;;  %v341_v1 = vor.u32 %v340_v40, %v339_v52 }
  0xae   : > { %v257_v2 = vsel %vm251_vm8, %v254_v51, %v256_v58  ;;  %v1675_v3 = vmul.u32.u64.low %v1616_v5, %v265_v0  ;;  %v1676_v10 = vmul.u32.u64.high %v1616_v5, %v265_v0, %v1675_v3  ;;  %v344_v16 = vor.u32 %v343_v57, %v342_v54 }
  0xaf   : > { %v454_v15 = vor.u32 %v453_v32, %v452_v19  ;;  %v1679_v22 = vmul.u32.u64.low %v1616_v5, %v261_v59  ;;  %v1680_v26 = vmul.u32.u64.high %v1616_v5, %v261_v59, %v1679_v22  ;;  %v338_v27 = vshrl.u32 %v1478_v21, %v1595_v47 }
  0xb0   : > { %v457_v29 = vor.u32 %v1658_v42, %v1652_v34  ;;  %v345_v61 = vshll.u32 %v1480_v28, %v1588_v41  ;;  %v346_v36 = vshrl.u32 %v1477_v53, %v1595_v47  ;;  %vm354_vm10 = vcmp.lt.s32.totalorder %v1607_v62, 1 }
  0xb1   : > { %v273_v19 = vmul.u32 %v1616_v5, %v257_v2  ;;  %vm355_vm11 = vcmp.lt.s32.totalorder %v1607_v62, 2  ;;  %vm356_vm12 = vcmp.lt.s32.totalorder %v1607_v62, 3  ;;  %v358_v32 = vsel %vm354_vm10, %v338_v27, %v341_v1 }
  0xb2   : > { %vm275_vm13 = vc.u32 %v1676_v10, %v1679_v22  ;;  %v347_v34 = vor.u32 %v346_v36, %v345_v61  ;;  %v362_v41 = vsel %vm354_vm10, %v341_v1, %v344_v16  ;;  %v368_v47 = vsel %vm356_vm12, %v1618_v9, %v367_v31 }
  0xb3   : > { %v276_v37 = vadd.s32 1, %v1680_v26  ;;  %v443_v5 = vshll.u32 %v1478_v21, %v1605_v60  ;;  %v444_v38 = vshrl.u32 %v1479_v23, %v1621_v11  ;;  %v446_v39 = vshll.u32 %v1479_v23, %v1605_v60 }
  0xb4   : > { %v359_v42 = vsel %vm357_vm5, %v347_v34, 2102212464  ;;  %v364_v43 = vsel %vm356_vm12, %v347_v34, %v363_v30  ;;  %v366_v44 = vsel %vm354_vm10, %v344_v16, %v347_v34  ;;  %v447_v9 = vshrl.u32 %v1480_v28, %v1621_v11 }
  0xb5   : > { %v277_v31 = vsel %vm275_vm13, %v276_v37, %v1680_v26  ;;  %v360_v46 = vsel %vm356_vm12, %v344_v16, %v359_v42  ;;  %v365_v49 = vsel %vm355_vm11, %v362_v41, %v364_v43  ;;  %v369_v51 = vsel %vm355_vm11, %v366_v44, %v368_v47 }
  0xb6   : > { %v278_v52 = vadd.s32 %v277_v31, %v273_v19  ;;  %v361_v40 = vsel %vm355_vm11, %v358_v32, %v360_v46  ;;  %v1723_v30 = vmul.u32.u64.low %v1623_v12, %v369_v51  ;;  %v1724_v54 = vmul.u32.u64.high %v1623_v12, %v369_v51, %v1723_v30 }
  0xb7   : > { %v467_v55 = vsel %vm461_vm9, %v454_v15, 920167782  ;;  %v1729_v56 = vmul.u32.u64.low %v1623_v12, %v365_v49  ;;  %v1730_v45 = vmul.u32.u64.high %v1623_v12, %v365_v49, %v1729_v56  ;;  %v445_v57 = vor.u32 %v444_v38, %v443_v5 }
  0xb8   : > { %v279_v58 = vadd.s32 536870912, %v278_v52  ;;  %v448_v59 = vor.u32 %v447_v9, %v446_v39  ;;  %v449_v0 = vshll.u32 %v1480_v28, %v1605_v60  ;;  %v450_v62 = vshrl.u32 %v1477_v53, %v1621_v11 }
  0xb9   : > { %v471_v1 = vsel %vm461_vm9, %v457_v29, 1326507024  ;;  %v377_v2 = vmul.u32 %v1623_v12, %v361_v40  ;;  %v434_v3 = vor.u32 8388608, %v1630_v14  ;;  %v442_v16 = vshrl.u32 %v1478_v21, %v1621_v11 }
  0xba   : > { %v280_v26 = vshrl.u32 %v279_v58, 30  ;;  %vm379_vm14 = vc.u32 %v1724_v54, %v1729_v56  ;;  %v451_v27 = vor.u32 %v450_v62, %v449_v0  ;;  %vm458_vm15 = vcmp.lt.s32.totalorder %v1626_v13, 1 }
  0xbb   : > { %v380_v60 = vadd.s32 1, %v1730_v45  ;;  %vm459_vm0 = vcmp.lt.s32.totalorder %v1626_v13, 2  ;;  %vm460_vm1 = vcmp.lt.s32.totalorder %v1626_v13, 3  ;;  %v466_v12 = vsel %vm458_vm15, %v445_v57, %v448_v59 }
  0xbc   : > { %v281_v14 = vshll.u32 %v280_v26, 30  ;;  %v463_v11 = vsel %vm461_vm9, %v451_v27, 2102212464  ;;  %v468_v29 = vsel %vm460_vm1, %v451_v27, %v467_v55  ;;  %v472_v61 = vsel %vm460_vm1, %v454_v15, %v471_v1 }
  0xbd   : > { %v381_v36 = vsel %vm379_vm14, %v380_v60, %v1730_v45  ;;  %v469_v19 = vsel %vm459_vm0, %v466_v12, %v468_v29  ;;  %v470_v32 = vsel %vm458_vm15, %v448_v59, %v451_v27  ;;  %v474_v34 = vshll.u32 %v434_v3, 8 }
  0xbe   : > { %v1759_v41 = vsub.s32 32, %v1637_v20  ;;  %v282_v47 = vsub.s32 %v278_v52, %v281_v14  ;;  %v382_v37 = vadd.s32 %v381_v36, %v377_v2  ;;  %v462_v5 = vsel %vm458_vm15, %v442_v16, %v445_v57 }
  0xbf   : > { %v464_v38 = vsel %vm460_vm1, %v448_v59, %v463_v11  ;;  %v473_v15 = vsel %vm459_vm0, %v470_v32, %v472_v61  ;;  %v1765_v39 = vmul.u32.u64.low %v474_v34, %v469_v19  ;;  %v1766_v42 = vmul.u32.u64.high %v474_v34, %v469_v19, %v1765_v39 }
  0xc0   : > { %v284_v43 = vsub.s32 0, %v282_v47  ;;  %v383_v44 = vadd.s32 536870912, %v382_v37  ;;  %v304_v9 = vsub.s32 4, %v280_v26  ;;  %v557_v49 = vshrl.u32 %v1475_v48, %v1759_v41 }
  0xc1   : > { %v1769_v31 = vmul.u32.u64.low %v474_v34, %v473_v15  ;;  %v1770_v46 = vmul.u32.u64.high %v474_v34, %v473_v15, %v1769_v31  ;;  %v465_v40 = vsel %vm459_vm0, %v462_v5, %v464_v38  ;;  %v560_v30 = vshrl.u32 %v1476_v50, %v1759_v41 }
  0xc2   : > { %v1270_v51 = vmin.u32 %v284_v43, %v282_v47  ;;  %v1774_v52 = vshrl.u32 %v383_v44, 30  ;;  %vm220_vm2 = vcmp.lt.s32.totalorder %v1574_v17, 0  ;;  %v484_v55 = vadd.s32 1, %v1766_v42 }
  0xc3   : > { %v1783_v45 = vshrl.u32 %v1614_v4, 5  ;;  %v556_v57 = vshll.u32 %v1477_v53, %v1637_v20  ;;  %v559_v58 = vshll.u32 %v1475_v48, %v1637_v20  ;;  %v305_v13 = vsel %vm220_vm2, %v304_v9, %v280_v26 }
  0xc4   : > { %v286_v59 = vclz %v1270_v51  ;;  %v385_v0 = vshll.u32 %v1774_v52, 30  ;;  %v481_v50 = vmul.u32 %v474_v34, %v465_v40  ;;  %vm483_vm3 = vc.u32 %v1770_v46, %v1765_v39 }
  0xc5   : > { %v1794_v62 = vor.u32 %v557_v49, %v556_v57  ;;  %v485_v1 = vsel %vm483_vm3, %v484_v55, %v1766_v42  ;;  %v561_v2 = vor.u32 %v560_v30, %v559_v58  ;;  %vm1799_vm4 = vcmp.le.f32.partialorder %v218_v33, 0.7853982 }
  0xc6   : > { %v1271_v4 = vadd.s32 4294967294, %v286_v59  ;;  %v1803_v3 = vsub.s32 %v382_v37, %v385_v0  ;;  %v486_v16 = vadd.s32 %v485_v1, %v481_v50  ;;  %vm565_vm5 = vcmp.lt.s32.totalorder %v1783_v45, 4 }
  0xc7   : > { %v1808_v26 = vsel %vm1799_vm4, 0, %v305_v13  ;;  %v530_v14 = vand.u32 2147483647, %v1582_v25  ;;  %v571_v33 = vsel %vm565_vm5, %v1794_v62, 920167782  ;;  %v274_v11 = vadd.s32 %v1679_v22, %v1676_v10 }
  0xc8   : > { %vm1272_vm6 = vcmp.lt.s32.totalorder %v1271_v4, 0  ;;  %v388_v60 = vsub.s32 0, %v1803_v3  ;;  %v487_v12 = vadd.s32 536870912, %v486_v16  ;;  %v575_v36 = vsel %vm565_vm5, %v561_v2, 1326507024 }
  0xc9   : > { %v289_v27 = vsel %vm1272_vm6, 0, %v1271_v4  ;;  %vm324_vm7 = vcmp.lt.s32.totalorder %v1576_v18, 0  ;;  %v378_v19 = vadd.s32 %v1729_v56, %v1724_v54  ;;  %v1826_v15 = vadd.s32 3, %v1808_v26 }
  0xca   : > { %v290_v29 = vsub.s32 32, %v289_v27  ;;  %v294_v61 = vsub.s32 4294967266, %v289_v27  ;;  %v1274_v32 = vmin.u32 %v388_v60, %v1803_v3  ;;  %v1823_v34 = vshrl.u32 %v487_v12, 30 }
  0xcb   : > { %v291_v37 = vshll.u32 %v282_v47, %v289_v27  ;;  %v537_v22 = vand.u32 8388607, %v530_v14  ;;  %v548_v42 = vshrl.u32 %v1479_v23, %v1759_v41  ;;  %v551_v54 = vshrl.u32 %v1480_v28, %v1759_v41 }
  0xcc   : > { %v292_v5 = vshrl.u32 %v274_v11, %v290_v29  ;;  %v295_v38 = vadd.s32 127, %v294_v61  ;;  %v390_v10 = vclz %v1274_v32  ;;  %v489_v44 = vshll.u32 %v1823_v34, 30 }
  0xcd   : > { %v546_v47 = vshrl.u32 %v1478_v21, %v1759_v41  ;;  %v547_v31 = vshll.u32 %v1478_v21, %v1637_v20  ;;  %v550_v49 = vshll.u32 %v1479_v23, %v1637_v20  ;;  %v554_v51 = vshrl.u32 %v1477_v53, %v1759_v41 }
  0xce   : > { %v293_v56 = vor.u32 %v292_v5, %v291_v37  ;;  %v296_v43 = vshll.u32 %v295_v38, 23  ;;  %v1275_v9 = vadd.s32 4294967294, %v390_v10  ;;  %v408_v30 = vsub.s32 4, %v1774_v52 }
  0xcf   : > { %v482_v55 = vadd.s32 %v1765_v39, %v1770_v46  ;;  %v490_v57 = vsub.s32 %v486_v16, %v489_v44  ;;  %v549_v58 = vor.u32 %v548_v42, %v547_v31  ;;  %v552_v59 = vor.u32 %v551_v54, %v550_v49 }
  0xd0   : > { %v297_v40 = vor.u32 4788187, %v296_v43  ;;  %vm1276_vm8 = vcmp.lt.s32.totalorder %v1275_v9, 0  ;;  %v553_v13 = vshll.u32 %v1480_v28, %v1637_v20  ;;  %v300_v0 = vcvt.s32.f32 %v293_v56 }
  0xd1   : > { %v393_v50 = vsel %vm1276_vm8, 0, %v1275_v9  ;;  %v492_v23 = vsub.s32 0, %v490_v57  ;;  %v538_v53 = vor.u32 8388608, %v537_v22  ;;  %v409_v39 = vsel %vm324_vm7, %v408_v30, %v1774_v52 }
  0xd2   : > { %v298_v21 = vand.u32 2147483647, %v297_v40  ;;  %v394_v4 = vsub.s32 32, %v393_v50  ;;  %v398_v1 = vsub.s32 4294967266, %v393_v50  ;;  %v555_v41 = vor.u32 %v554_v51, %v553_v13 }
  0xd3   : > { %v1278_v46 = vmin.u32 %v492_v23, %v490_v57  ;;  %v512_v16 = vsub.s32 4, %v1823_v34  ;;  %v395_v27 = vshll.u32 %v1803_v3, %v393_v50  ;;  %vm562_vm9 = vcmp.lt.s32.totalorder %v1783_v45, 1 }
  0xd4   : > { %v301_v2 = vmul.f32 %v300_v0, %v298_v21  ;;  %v396_v60 = vshrl.u32 %v378_v19, %v394_v4  ;;  %v399_v20 = vadd.s32 127, %v398_v1  ;;  %vm1856_vm10 = vcmp.le.f32.partialorder %v322_v35, 0.7853982 }
  0xd5   : > { %v494_v11 = vclz %v1278_v46  ;;  %vm564_vm11 = vcmp.lt.s32.totalorder %v1783_v45, 3  ;;  %v570_v52 = vsel %vm562_vm9, %v549_v58, %v552_v59  ;;  %vm563_vm12 = vcmp.lt.s32.totalorder %v1783_v45, 2 }
  0xd6   : > { %v302_v28 = vxor.u32 2147483648, %v301_v2  ;;  %v397_v29 = vor.u32 %v396_v60, %v395_v27  ;;  %v400_v61 = vshll.u32 %v399_v20, 23  ;;  %v572_v3 = vsel %vm564_vm11, %v555_v41, %v571_v33 }
  0xd7   : > { %v1279_v35 = vadd.s32 4294967294, %v494_v11  ;;  %v567_v32 = vsel %vm565_vm5, %v555_v41, 2102212464  ;;  %v574_v37 = vsel %vm562_vm9, %v552_v59, %v555_v41  ;;  %v573_v10 = vsel %vm563_vm12, %v570_v52, %v572_v3 }
  0xd8   : > { %v303_v19 = vsel %vm220_vm2, %v302_v28, %v301_v2  ;;  %v401_v38 = vor.u32 4788187, %v400_v61  ;;  %v576_v33 = vsel %vm564_vm11, %v1794_v62, %v575_v36  ;;  %v404_v22 = vcvt.s32.f32 %v397_v29 }
  0xd9   : > { %v306_v5 = vsel %vm1799_vm4, %v1574_v17, %v303_v19  ;;  %vm1280_vm13 = vcmp.lt.s32.totalorder %v1279_v35, 0  ;;  %v577_v42 = vsel %vm563_vm12, %v574_v37, %v576_v33  ;;  %v578_v43 = vshll.u32 %v538_v53, 8 }
  0xda   : > { %1383 = vcosq.f32 %v306_v5  ;;  %v402_v54 = vand.u32 2147483647, %v401_v38  ;;  %v497_v56 = vsel %vm1280_vm13, 0, %v1279_v35  ;;  %v566_v9 = vsel %vm562_vm9, %v546_v47, %v549_v58 }
  0xdb   : > { %1385 = vsinq.f32 %v306_v5  ;;  %v498_v48 = vsub.s32 32, %v497_v56  ;;  %v502_v44 = vsub.s32 4294967266, %v497_v56  ;;  %v568_v31 = vsel %vm564_vm11, %v552_v59, %v567_v32 }
  0xdc   : > { %v405_v49 = vmul.f32 %v404_v22, %v402_v54  ;;  %v499_v62 = vshll.u32 %v490_v57, %v497_v56  ;;  %v1886_v36 = vmul.u32.u64.low %v578_v43, %v577_v42  ;;  %v1887_v51 = vmul.u32.u64.high %v578_v43, %v577_v42, %v1886_v36 }
  0xdd   : > { %v500_v40 = vshrl.u32 %v482_v55, %v498_v48  ;;  %v503_v30 = vadd.s32 127, %v502_v44  ;;  %v1889_v13 = vmul.u32.u64.low %v578_v43, %v573_v10  ;;  %v1890_v21 = vmul.u32.u64.high %v578_v43, %v573_v10, %v1889_v13 }
  0xde   : > { %v406_v0 = vxor.u32 2147483648, %v405_v49  ;;  %v411_v50 = vsel %vm1856_vm10, 0, %v409_v39  ;;  %vm428_vm14 = vcmp.lt.s32.totalorder %v1580_v24, 0  ;;  %v569_v55 = vsel %vm563_vm12, %v566_v9, %v568_v31 }
  0xdf   : > { %v501_v47 = vor.u32 %v500_v40, %v499_v62  ;;  %v504_v58 = vshll.u32 %v503_v30, 23  ;;  %v513_v57 = vsel %vm428_vm14, %v512_v16, %v1823_v34  ;;  %v312_v59 = vand.u32 3, %v1826_v15 }
  0xe0   : > { %v407_v23 = vsel %vm324_vm7, %v406_v0, %v405_v49  ;;  %vm1906_vm15 = vcmp.le.f32.partialorder %v426_v63, 0.7853982  ;;  %vm587_vm0 = vc.u32 %v1887_v51, %v1889_v13  ;;  %v415_v45 = vadd.s32 3, %v411_v50 }
  0xe1   : > { %v410_v34 = vsel %vm1856_vm10, %v1576_v18, %v407_v23  ;;  %v505_v1 = vor.u32 4788187, %v504_v58  ;;  %v588_v15 = vadd.s32 1, %v1890_v21  ;;  %v515_v53 = vsel %vm1906_vm15, 0, %v513_v57 }
  0xe2   : > { %1387 = vcosq.f32 %v410_v34  ;;  %v585_v41 = vmul.u32 %v578_v43, %v569_v55  ;;  %v508_v39 = vcvt.s32.f32 %v501_v47  ;;  %vm314_vm1 = vcmp.eq.s32.totalorder %v312_v59, 0 }
  0xe3   : > { %1389 = vsinq.f32 %v410_v34  ;;  %v506_v2 = vand.u32 2147483647, %v505_v1  ;;  %v589_v46 = vsel %vm587_vm0, %v588_v15, %v1890_v21  ;;  %vm317_vm2 = vcmp.eq.s32.totalorder %v312_v59, 2 }
  0xe4   : > { %v1384_v63 = vpop.eup %1383  ;;  %1391 = vrcp.f32 %v1574_v17  ;;  %v590_v60 = vadd.s32 %v589_v46, %v585_v41  ;;  %v416_v28 = vand.u32 3, %v415_v45  ;;  %v519_v52 = vadd.s32 3, %v515_v53 }
  0xe5   : > { %v1386_v16 = vpop.eup %1385  ;;  %v318_v27 = vxor.u32 2147483648, %v1384_v63  ;;  %v509_v12 = vmul.f32 %v508_v39, %v506_v2  ;;  %v727_v61 = vand.u32 3, %v1808_v26  ;;  %1393 = vrcp.f32 %v1576_v18  ;;  %v1974_v2 = vpop.permute.xlu1 %1074 }
  0xe6   : > { %v315_v20 = vxor.u32 2147483648, %v1386_v16  ;;  %v591_v29 = vadd.s32 536870912, %v590_v60  ;;  %1395 = vrcp.f32 %v1580_v24  ;;  %vm310_vm3 = vweird.f32 %v1574_v17 }
  0xe7   : > { %v319_v11 = vsel %vm317_vm2, %v318_v27, %v1386_v16  ;;  %v510_v19 = vxor.u32 2147483648, %v509_v12  ;;  %vm313_vm4 = vcmp.lt.s32.totalorder %v312_v59, 2  ;;  %vm414_vm5 = vweird.f32 %v1576_v18 }
  0xe8   : > { %v316_v3 = vsel %vm314_vm1, %v1384_v63, %v315_v20  ;;  %v1924_v35 = vshrl.u32 %v591_v29, 30  ;;  %vm417_vm6 = vcmp.lt.s32.totalorder %v416_v28, 2  ;;  %vm418_vm7 = vcmp.eq.s32.totalorder %v416_v28, 0 }
  0xe9   : > { %v320_v32 = vsel %vm313_vm4, %v316_v3, %v319_v11  ;;  %v511_v37 = vsel %vm428_vm14, %v510_v19, %v509_v12  ;;  %v1932_v5 = vand.u32 3, %v519_v52  ;;  %vm732_vm8 = vcmp.eq.s32.totalorder %v727_v61, 2 }
  0xea   : > { %v514_v26 = vsel %vm1906_vm15, %v1580_v24, %v511_v37  ;;  %v593_v38 = vshll.u32 %v1924_v35, 30  ;;  %vm729_vm9 = vcmp.eq.s32.totalorder %v727_v61, 0  ;;  %v734_v10 = vsel %vm732_vm8, %v318_v27, %v1386_v16 }
  0xeb   : > { %1397 = vcosq.f32 %v514_v26  ;;  %v830_v33 = vand.u32 3, %v411_v50  ;;  %v321_v42 = vsel %vm310_vm3, nan, %v320_v32  ;;  %v731_v56 = vsel %vm729_vm9, %v1384_v63, %v315_v20 }
  0xec   : > { %v1388_v22 = vpop.eup %1387  ;;  %1399 = vsinq.f32 %v514_v26  ;;  %v1937_v54 = vsub.s32 %v590_v60, %v593_v38  ;;  %vm421_vm10 = vcmp.eq.s32.totalorder %v416_v28, 2  ;;  %v1940_v44 = vsub.s32 1, %v1567_v7  ;;  %v2002_v38 = vpop.permute.xlu1 %1078 }
  0xed   : > { %v1390_v43 = vpop.eup %1389  ;;  %v422_v48 = vxor.u32 2147483648, %v1388_v22  ;;  %v1092_v9 = vsub.s32 3, %v1567_v7  ;;  %v1946_v36 = vand.u32 3, %v515_v53  ;;  %vm728_vm11 = vcmp.lt.s32.totalorder %v727_v61, 2 }
  0xee   : > { %v1943_v31 = vpop.eup %1391  ;;  %v419_v49 = vxor.u32 2147483648, %v1390_v43  ;;  %v596_v62 = vsub.s32 0, %v1937_v54  ;;  %vm525_vm12 = vcmp.eq.s32.totalorder %v1932_v5, 2  ;;  %v735_v21 = vsel %vm728_vm11, %v731_v56, %v734_v10 }
  0xef   : > { %v423_v40 = vsel %vm421_vm10, %v422_v48, %v1390_v43  ;;  %v1949_v30 = vmul.f32 %v1943_v31, %v321_v42  ;;  %vm835_vm13 = vcmp.eq.s32.totalorder %v830_v33, 2  ;;  %vm522_vm14 = vcmp.eq.s32.totalorder %v1932_v5, 0  ;;  %v1394_v58 = vpop.eup %1393 }
  0xf0   : > { %v420_v0 = vsel %vm418_vm7, %v1388_v22, %v419_v49  ;;  %v1282_v50 = vmin.u32 %v596_v62, %v1937_v54  ;;  %vm832_vm15 = vcmp.eq.s32.totalorder %v830_v33, 0  ;;  %v837_v47 = vsel %vm835_vm13, %v422_v48, %v1390_v43  ;;  %v1962_v4 = vpop.eup %1395 }
  0xf1   : > { %v424_v57 = vsel %vm417_vm6, %v420_v0, %v423_v40  ;;  %vm521_vm0 = vcmp.lt.s32.totalorder %v1932_v5, 2  ;;  %v1089_v55 = vrot.slane %v1569_v8, %v1940_v44  ;;  %v1093_v59 = vrot.slane %v1569_v8, %v1092_v9 }
  0xf2   : > { %v834_v23 = vsel %vm832_vm15, %v1388_v22, %v419_v49  ;;  %v425_v34 = vsel %vm414_vm5, nan, %v424_v57  ;;  %vm518_vm1 = vweird.f32 %v1580_v24  ;;  %v598_v45 = vclz %v1282_v50 }
  0xf3   : > { %v736_v1 = vsel %vm310_vm3, nan, %v735_v21  ;;  %vm831_vm2 = vcmp.lt.s32.totalorder %v830_v33, 2  ;;  %v1969_v15 = vmul.f32 %v1394_v58, %v425_v34  ;;  %v586_v53 = vadd.s32 %v1889_v13, %v1887_v51 }
  0xf4   : > { %v838_v41 = vsel %vm831_vm2, %v834_v23, %v837_v47  ;;  %v1050_v63 = vsub.f32 %v1949_v30, %v736_v1  ;;  %v1283_v39 = vadd.s32 4294967294, %v598_v45  ;;  %vm934_vm4 = vcmp.lt.s32.totalorder %v1946_v36, 2  ;;  %v1110_v23 = vpop.permute.xlu0 %1109 }
  0xf5   : > { %vm935_vm6 = vcmp.eq.s32.totalorder %v1946_v36, 0  ;;  %v839_v17 = vsel %vm414_vm5, nan, %v838_v41  ;;  %v1398_v46 = vpop.eup %1397  ;;  %vm938_vm3 = vcmp.eq.s32.totalorder %v1946_v36, 2  ;;  %v1099_v16 = vrot.slane %v1089_v55, %v1940_v44 }
  0xf6   : > { %v1983_v51 = vrot.slane %v1093_v59, %v1940_v44  ;;  %v1051_v13 = vsub.f32 %v1969_v15, %v839_v17  ;;  %v1400_v27 = vpop.eup %1399  ;;  %v526_v60 = vxor.u32 2147483648, %v1398_v46  ;;  %vm1284_vm7 = vcmp.lt.s32.totalorder %v1283_v39, 0 }
  0xf7   : > { %v616_v20 = vsub.s32 4, %v1924_v35  ;;  %v1165_v28 = vand.u32 127, %v188_v6  ;;  %v523_v18 = vxor.u32 2147483648, %v1400_v27  ;;  %v601_v12 = vsel %vm1284_vm7, 0, %v1283_v39 }
  0xf8   : > { %v1054_v11 = vmul.f32 %v1943_v31, %v1050_v63  ;;  %v1070_v52 = vmul.f32 1.5, %v1569_v8  ;;  %v527_v29 = vsel %vm525_vm12, %v526_v60, %v1400_v27  ;;  %v602_v61 = vsub.s32 32, %v601_v12 }
  0xf9   : > { %v606_v3 = vsub.s32 4294967266, %v601_v12  ;;  %v1055_v19 = vmul.f32 %v1394_v58, %v1051_v13  ;;  %v524_v32 = vsel %vm522_vm14, %v1398_v46, %v523_v18  ;;  %v603_v37 = vshll.u32 %v1937_v54, %v601_v12 }
  0xfa   : > { %v937_v6 = vsel %vm935_vm6, %v1398_v46, %v523_v18  ;;  %v940_v26 = vsel %vm938_vm3, %v526_v60, %v1400_v27  ;;  %v528_v10 = vsel %vm521_vm0, %v524_v32, %v527_v29  ;;  %vm532_vm5 = vcmp.lt.s32.totalorder %v1582_v25, 0 }
  0xfb   : > { %v604_v33 = vshrl.u32 %v586_v53, %v602_v61  ;;  %v607_v22 = vadd.s32 127, %v606_v3  ;;  %v941_v42 = vsel %vm934_vm4, %v937_v6, %v940_v26  ;;  %v529_v54 = vsel %vm518_vm1, nan, %v528_v10  ;;  %v1153_v3 = vpop.permute.xlu0 %1152 }
  0xfc   : > { %v1166_v56 = vadd.s32 128, %v1165_v28  ;;  %v1058_v43 = vmul.f32 3.0, %v1943_v31  ;;  %v1059_v48 = vmul.f32 3.0, %v1394_v58  ;;  %v1048_v5 = vmul.f32 %v1962_v4, %v529_v54  ;;  %v2024_v58 = vpop.permute.xlu1 %1113 }
  0xfd   : > { %v605_v49 = vor.u32 %v604_v33, %v603_v37  ;;  %v608_v62 = vshll.u32 %v607_v22, 23  ;;  %v1167_v40 = vstv %s1302_s8  ;;  %v942_v21 = vsel %vm518_vm1, nan, %v941_v42 }
  0xfe   : > { %v1062_v0 = vmul.f32 %v1058_v43, %v1054_v11  ;;  %v1063_v36 = vmul.f32 %v1059_v48, %v1055_v19  ;;  %v1071_v50 = vmul.f32 %v1070_v52, %v1569_v8  ;;  %vm2020_vm8 = vcmp.le.f32.partialorder %v530_v14, 0.7853982 }
  0xff   : > { %v609_v31 = vor.u32 4788187, %v608_v62  ;;  %v1052_v57 = vsub.f32 %v1048_v5, %v942_v21  ;;  %v1104_v55 = vmul.f32 %v1099_v16, %v1054_v11  ;;  %v1171_v59 = vstv %s1988_s7 }
 0x100   : > { %v1081_v24 = vmul.f32 %v1974_v2, %v1949_v30  ;;  %v1105_v34 = vmul.f32 %v1983_v51, %v1055_v19  ;;  %v1168_v45 = vadd.s32 %v1167_v40, %v1165_v28  ;;  %v1301_v8 = vadd.f32 -0.5, %v1071_v50  ;;  %v1149_v52 = vpop.permute.xlu1 %1148 }
 0x101   : > { %v610_v1 = vand.u32 2147483647, %v609_v31  ;;  %v612_v14 = vcvt.s32.f32 %v605_v49  ;;  %v1056_v53 = vmul.f32 %v1962_v4, %v1052_v57  ;;  %v1060_v41 = vmul.f32 3.0, %v1962_v4 }
 0x102   : > { %v1066_v63 = vsub.f32 %v1062_v0, %v1949_v30  ;;  %v1067_v39 = vsub.f32 %v1063_v36, %v1969_v15  ;;  %v1128_v17 = vrot.slane %v1301_v8, %v1940_v44  ;;  %v1132_v46 = vrot.slane %v1301_v8, %v1092_v9 }
 0x103   : > { %v613_v13 = vmul.f32 %v612_v14, %v610_v1  ;;  %v1106_v27 = vmul.f32 %v1099_v16, %v1056_v53  ;;  %v1116_v60 = vmul.f32 %v1110_v23, %v1104_v55  ;;  %v1064_v28 = vmul.f32 %v1060_v41, %v1056_v53 }
 0x104   : > { %v617_v18 = vsel %vm532_vm5, %v616_v20, %v1924_v35  ;;  %v1117_v12 = vmul.f32 %v1110_v23, %v1105_v34  ;;  %v1138_v30 = vrot.slane %v1128_v17, %v1940_v44  ;;  %v2043_v4 = vrot.slane %v1132_v46, %v1940_v44 }
 0x105   : > { %v614_v11 = vxor.u32 2147483648, %v613_v13  ;;  %v1118_v7 = vmul.f32 %v2024_v58, %v1106_v27  ;;  %v1169_v9 = vadd.s32 %v1167_v40, %v1166_v56  ;;  %v1068_v16 = vsub.f32 %v1064_v28, %v1048_v5 }
 0x106   : > { %v1082_v29 = vmul.f32 %v1974_v2, %v1969_v15  ;;  %vm2048_vm9 = vcmp.lt.s32.totalorder %v1168_v45, %v1171_v59  ;;  %v1143_v35 = vmul.f32 %v1138_v30, %v1066_v63  ;;  %v1144_v20 = vmul.f32 %v2043_v4, %v1067_v39 }
 0x107   : > { %v615_v44 = vsel %vm532_vm5, %v614_v11, %v613_v13  ;;  %v1083_v19 = vmul.f32 %v2002_v38, %v1048_v5  ;;  %v1120_v32 = vadd.f32 %v1116_v60, %v1081_v24  ;;  %v1145_v37 = vmul.f32 %v1138_v30, %v1068_v16 }
 0x108   : > { %v618_v15 = vsel %vm2020_vm8, %v1582_v25, %v615_v44  ;;  %v1121_v2 = vadd.f32 %v1117_v12, %v1082_v29  ;;  %v1155_v6 = vmul.f32 %v1149_v52, %v1143_v35  ;;  %v1156_v26 = vmul.f32 %v1149_v52, %v1144_v20 }
 0x109   : > { %1401 = vcosq.f32 %v618_v15  ;;  %v1122_v10 = vadd.f32 %v1118_v7, %v1083_v19  ;;  %vm2061_vm10 = vcmp.lt.s32.totalorder %v1169_v9, %v1171_v59  ;;  %v1157_v22 = vmul.f32 %v1153_v3, %v1145_v37 }
 0x10a   : > { %v619_v42 = vsel %vm2020_vm8, 0, %v617_v18  ;;  %1403 = vsinq.f32 %v618_v15  ;;  %v1159_v54 = vadd.f32 %v1155_v6, %v1120_v32  ;;  %v1160_v56 = vadd.f32 %v1156_v26, %v1121_v2 }
 0x10b   : > { %v1161_v43 = vadd.f32 %v1157_v22, %v1122_v10  ;;  %v623_v62 = vadd.s32 3, %v619_v42  ;;  %1405 = vrcp.f32 %v1582_v25  ;;  %v1036_v21 = vand.u32 3, %v619_v42 }
 0x10c   : > { %v1178_v48 = vsel %vm2048_vm9, %v1159_v54, 0.0  ;;  %v1179_v49 = vsel %vm2061_vm10, %v1160_v56, 0.0  ;;  %vm622_vm1 = vweird.f32 %v1582_v25 }
 0x10d   : > { %1182 = vst [vmem:[%s2071_s11] sm:$0xff] %v1178_v48  ;;  %1183 = vst [vmem:[%s2071_s11 + $0x8] sm:$0xff] %v1179_v49  ;;  %v1180_v5 = vsel %vm2048_vm9, %v1161_v43, 0.0  ;;  %v624_v40 = vand.u32 3, %v623_v62  ;;  %vm1041_vm12 = vcmp.eq.s32.totalorder %v1036_v21, 2  ;;  %vm1038_vm14 = vcmp.eq.s32.totalorder %v1036_v21, 0 }
 0x10e   : > { %1184 = vst [vmem:[%s2071_s11 + $0x10] sm:$0x1] %v1180_v5  ;;  %vm1037_vm0 = vcmp.lt.s32.totalorder %v1036_v21, 2 }
 0x10f   : > { %vm629_vm11 = vcmp.eq.s32.totalorder %v624_v40, 2  ;;  %vm626_vm13 = vcmp.eq.s32.totalorder %v624_v40, 0  ;;  %vm625_vm15 = vcmp.lt.s32.totalorder %v624_v40, 2 }
 0x113   : > { %v1402_v0 = vpop.eup %1401 }
 0x114   : > { %v1404_v36 = vpop.eup %1403  ;;  %v630_v50 = vxor.u32 2147483648, %v1402_v0 }
 0x115   : > { %v627_v47 = vxor.u32 2147483648, %v1404_v36  ;;  %v1406_v34 = vpop.eup %1405 }
 0x116   : > { %v631_v31 = vsel %vm629_vm11, %v630_v50, %v1404_v36  ;;  %v1043_v57 = vsel %vm1041_vm12, %v630_v50, %v1404_v36  ;;  %v1061_v41 = vmul.f32 3.0, %v1406_v34 }
 0x117   : > { %v628_v55 = vsel %vm626_vm13, %v1402_v0, %v627_v47  ;;  %v1040_v59 = vsel %vm1038_vm14, %v1402_v0, %v627_v47 }
 0x118   : > { %v632_v24 = vsel %vm625_vm15, %v628_v55, %v631_v31  ;;  %v1044_v23 = vsel %vm1037_vm0, %v1040_v59, %v1043_v57 }
 0x119   : > { %v633_v45 = vsel %vm622_vm1, nan, %v632_v24  ;;  %v1045_v1 = vsel %vm622_vm1, nan, %v1044_v23 }
 0x11a   : > { %v1049_v8 = vmul.f32 %v1406_v34, %v633_v45 }
 0x11c   : > { %v1053_v14 = vsub.f32 %v1049_v8, %v1045_v1  ;;  %v1084_v46 = vmul.f32 %v2002_v38, %v1049_v8 }
 0x11e   : > { %v1057_v53 = vmul.f32 %v1406_v34, %v1053_v14 }
 0x120   : > { %v1107_v63 = vmul.f32 %v1983_v51, %v1057_v53  ;;  %v1065_v39 = vmul.f32 %v1061_v41, %v1057_v53 }
 0x122   : > { %v1119_v17 = vmul.f32 %v2024_v58, %v1107_v63  ;;  %v1069_v25 = vsub.f32 %v1065_v39, %v1049_v8 }
 0x124   : > { %v1146_v13 = vmul.f32 %v2043_v4, %v1069_v25  ;;  %v1123_v27 = vadd.f32 %v1119_v17, %v1084_v46 }
 0x126   : > { %v1158_v60 = vmul.f32 %v1153_v3, %v1146_v13 }
 0x128   : > { %v1162_v51 = vadd.f32 %v1158_v60, %v1123_v27 }
 0x12a   : > { %v1181_v38 = vsel %vm2061_vm10, %v1162_v51, 0.0 }
 0x12b   : > { %1185 = vst [vmem:[%s2071_s11 + $0x18] sm:$0x1] %v1181_v38 }
 0x12c   : > { %1420 = shalt.err (!%p1417_p3)
}
 0x12d   : > { %s1421_s28 = scalar_lea.hbm %s2090_s20, 512  ;;  %s1425_s4 = scalar_lea.hbm %s2143_s3, 1024 }
 0x12e   : > { %p1422_p4 = scmp.ne.s32.totalorder %s2090_s20, %s1421_s28  ;;  %p1426_p9 = scmp.lt.u32.totalorder %s2090_s20, %s2143_s3 }
 0x12f   : > { %p1427_p10 = scmp.lt.u32.totalorder %s1425_s4, %s1421_s28  ;;  %p1429_p12 = scmp.lt.u32.totalorder %s1421_s28, %s2090_s20 }
 0x130   : > { %p1423_p7 = pnand %p1422_p4, %p1546_p5 }
 0x131   : > { %p1428_p11 = por %p1427_p10, %p1426_p9 }
 0x132   : > { %p1424_p8 = pneg %p1423_p7 }
 0x133   : > { %p1430_p13 = por %p1429_p12, %p1428_p11 }
 0x135   : > { %p1431_p0 = pnand %p1430_p13, %p1424_p8 }
 0x137   : > { %1434 = shalt.err (!%p1431_p0)
}
 0x138   : > { %s1482_s7 = smov 256   ;;  %s1483_s8 = smov 512  }
 0x139   : > { %s1484_s9 = smov 16  }
 0x13a   : > { %1325 = dma.vmem_to_hbm [thread:$0]  (%p1546_p5), %s2092_s12, 512, %s2090_s20, %s2099_s21, %s1482_s7, %s1483_s8, %s1484_s9  }
 0x13b PF: > { %p1331_p1 = scmp.ge.s32.totalorder %s1469_s17, 2  ;;  %s1215_s10 = sand.u32 1, %s1457_s14  }
 0x13c   : > { %s1216_s11 = scalar_lea.sflag [#allocation4], %s1215_s10 }
 0x13d   : > { %p1328_p2 = pnand %p1331_p1, %p1550_p6 }
 0x13f   : > { %1452 = dma.done.wait (!%p1328_p2), %s1216_s11, 512  }
 0x140   : > { %1454 = vsyncadd (!%p1328_p2), %s1216_s11, 4294966784  ;;  %p14_p3 = scmp.ge.s32.totalorder %s1533_s19, 4   ;;  %s2158_s14 = smov %s1461_s15 }
 0x141   : > { %s2159_s15 = smov %s1465_s16  ;;  %s2160_s16 = smov %s1544_s22 }
 0x142   : > { %s2161_s17 = smov %s1533_s19  ;;  %16 = sbr.rel (!%p14_p3) target bundleno = 5 (0x5), region = 67 }
 0x149   :  { %1221 = vsyncpa [#allocation4], 1 }
 0x14a   :  { %1223 = vsyncpa [#allocation4 + $0x1], 1 }

</bundles_post_ra>
